<compile_context>
chip_gen: v5e
topology: v5e:2x2
jax: 0.10.0
libtpu: 0.0.40
codegen_flags: <defaults>
</compile_context>

<pallas_src>
import math

import jax
import jax.numpy as jnp
from jax.experimental import pallas as pl
from jax.experimental.pallas import tpu as pltpu


# ----------------------------------------------------------------------------
# Gaussian taps (compile-time constants; k2d == outer(taps, taps))
# ----------------------------------------------------------------------------
def gaussian_taps(ksize=5, sigma=5.0):
    mean = (ksize - 1) / 2.0
    g = [math.exp(-0.5 * ((i - mean) / sigma) ** 2) for i in range(ksize)]
    s = sum(g)
    return tuple(v / s for v in g)


# ----------------------------------------------------------------------------
# Fused kernel factory: blend -> separable 5-tap blur (masked tap weights)
# ----------------------------------------------------------------------------
def make_blend_blur_kernel(W, HW_pad, taps, BS):
    R = len(taps) // 2
    center = taps[R]
    offs = [d for d in range(-R, R + 1) if d != 0]       # (-2,-1,1,2)

    def kernel(rgb_ref, x_ref, m_ref, wh_ref, wv_ref, o_ref):
        # Masked tap weights are grid-resident; load each (1, HW_pad) row once.
        wh = [wh_ref[i] for i in range(len(offs))]
        wv = [wv_ref[i] for i in range(len(offs))]

        def shifted(v, lanes):
            # out[..., i] = v[..., i + lanes]   (wrap; masked weights zero the
            # taps whose source lane would fall outside the image)
            return pltpu.roll(v, shift=(-lanes) % HW_pad, axis=1)

        def blur_pass(v, stride, wts):
            # two independent accumulators -> shorter add dependency chain
            acc0 = center * v
            acc1 = jnp.zeros_like(v)
            for idx, d in enumerate(offs):
                t = shifted(v, d * stride) * wts[idx]     # (1,HWp) broadcast
                if idx % 2 == 0:
                    acc0 = acc0 + t
                else:
                    acc1 = acc1 + t
            return acc0 + acc1

        # Statically unrolled over the BS samples in this block: amortizes the
        # per-grid-step pipeline overhead while keeping all ops 2-D/lane-dense.
        for b in range(BS):
            x = x_ref[b]                                  # (C, HW_pad)
            m = m_ref[b]                                  # (1, HW_pad)
            rgb = rgb_ref[b]                              # (C, 1)
            im = x + m * (rgb - x)                        # blend
            o_ref[b] = blur_pass(blur_pass(im, 1, wh), W, wv)

    return kernel


# ----------------------------------------------------------------------------
# Wrapper
# ----------------------------------------------------------------------------
def generator_forward(features, x_img, mask, params, taps, block_samples=None):
    N, z_dim = features.shape
    _, C, H, W = x_img.shape
    HW = H * W
    HW_pad = ((HW + 127) // 128) * 128                    # lane-dense padding
    hp = jax.lax.Precision.HIGHEST

    w1, b1, w2, b2, w3, b3, w4, b4, w5, b5 = params

    # ----- hoisted MLP: one batched matmul chain in f32 / HIGHEST precision --
    h = features
    for wgt, b in ((w1, b1), (w2, b2), (w3, b3)):
        h = jnp.dot(h, wgt, precision=hp) + b
        h = jnp.where(h > 0, h, 0.2 * h)                  # LeakyReLU(0.2)
    h = jnp.dot(h, w4, precision=hp) + b4
    h = jnp.dot(h, w5, precision=hp) + b5
    rgb = jnp.tanh(h).reshape(N, C, 1)                    # (N, 3, 1)

    # ----- lane-dense (and lane-padded) image layout -------------------------
    x_flat = x_img.reshape(N, C, HW)
    m_flat = mask.reshape(N, 1, HW)
    if HW_pad != HW:
        pad = ((0, 0), (0, 0), (0, HW_pad - HW))
        x_flat = jnp.pad(x_flat, pad)
        m_flat = jnp.pad(m_flat, pad)

    # ----- precomputed masked tap weights (replace in-kernel iota/cmp/select)
    R = len(taps) // 2
    lane = jnp.arange(HW_pad)
    col = lane % W
    row = lane // W
    wh_rows, wv_rows = [], []
    for d in range(-R, R + 1):
        if d == 0:
            continue
        h_valid = (col + d >= 0) & (col + d < W)          # same image row
        v_valid = (row + d >= 0) & (row + d < H)          # inside image
        wh_rows.append(taps[d + R] * h_valid.astype(jnp.float32))
        wv_rows.append(taps[d + R] * v_valid.astype(jnp.float32))
    n_off = len(wh_rows)
    wh = jnp.stack(wh_rows).reshape(n_off, 1, HW_pad)
    wv = jnp.stack(wv_rows).reshape(n_off, 1, HW_pad)

    # ----- batch blocking: amortize per-grid-step overhead -------------------
    if block_samples is None:
        per_sample = (2 * C + 1) * HW_pad * 4 * 2         # x+out+mask, dbl-buf
        budget = 8 * 1024 * 1024
        BS = max(1, min(N, budget // max(per_sample, 1), 8))
    else:
        BS = block_samples
    while N % BS:
        BS -= 1

    kernel = make_blend_blur_kernel(W, HW_pad, taps, BS)

    out_flat = pl.pallas_call(
        kernel,
        out_shape=jax.ShapeDtypeStruct((N, C, HW_pad), jnp.float32),
        grid=(N // BS,),
        in_specs=[
            pl.BlockSpec((BS, C, 1), lambda n: (n, 0, 0)),        # rgb
            pl.BlockSpec((BS, C, HW_pad), lambda n: (n, 0, 0)),   # x_img
            pl.BlockSpec((BS, 1, HW_pad), lambda n: (n, 0, 0)),   # mask
            pl.BlockSpec((n_off, 1, HW_pad), lambda n: (0, 0, 0)),  # wh (const)
            pl.BlockSpec((n_off, 1, HW_pad), lambda n: (0, 0, 0)),  # wv (const)
        ],
        out_specs=pl.BlockSpec((BS, C, HW_pad), lambda n: (n, 0, 0)),
        compiler_params=pltpu.CompilerParams(
            dimension_semantics=("parallel",)),
    )(rgb, x_flat, m_flat, wh, wv)

    return out_flat[:, :, :HW].reshape(N, C, H, W)


# ----------------------------------------------------------------------------
# Parameter construction (deterministic, in-script)
# ----------------------------------------------------------------------------
def make_params(key, z_dim):
    dims = [(z_dim, 64), (64, 128), (128, 128), (128, z_dim), (z_dim, 3)]
    params = []
    for din, dout in dims:
        key, kw, kb = jax.random.split(key, 3)
        w = jax.random.normal(kw, (din, dout), jnp.float32) / jnp.sqrt(float(din))
        b = jax.random.normal(kb, (1, dout), jnp.float32) * 0.01
        params += [w, b]
    return params


# ----------------------------------------------------------------------------
# Pure-JAX reference (unfused, non-separable conv; correctness check only)
# ----------------------------------------------------------------------------
def reference_forward(features, x_img, mask, params, taps):
    N, _ = features.shape
    _, C, H, W = x_img.shape
    hp = jax.lax.Precision.HIGHEST
    w1, b1, w2, b2, w3, b3, w4, b4, w5, b5 = params

    h = features
    for wgt, b in ((w1, b1), (w2, b2), (w3, b3)):
        h = jnp.dot(h, wgt, precision=hp) + b
        h = jnp.where(h > 0, h, 0.2 * h)
    h = jnp.dot(h, w4, precision=hp) + b4
    h = jnp.dot(h, w5, precision=hp) + b5
    rgb = jnp.tanh(h).reshape(N, 3, 1, 1)

    bg = rgb * jnp.ones((N, 1, H, W), jnp.float32)
    m = jnp.broadcast_to(mask, (N, 3, H, W))
    im = m * bg + (1.0 - m) * x_img

    g = jnp.asarray(taps, jnp.float32)
    k2d = jnp.outer(g, g)
    wk = jnp.broadcast_to(k2d.reshape(1, 1, 5, 5), (3, 1, 5, 5))
    return jax.lax.conv_general_dilated(
        im, wk, window_strides=(1, 1), padding=[(2, 2), (2, 2)],
        dimension_numbers=("NCHW", "OIHW", "NCHW"),
        feature_group_count=3, precision=hp)


if __name__ == "__main__":
    N, z_dim, imsize = 2, 32, 16

    key = jax.random.PRNGKey(0)
    key, kf, kx, km, kp = jax.random.split(key, 5)

    features = jax.random.normal(kf, (N, z_dim), jnp.float32)
    x_img = jax.random.uniform(kx, (N, 3, imsize, imsize), jnp.float32,
                               minval=-1.0, maxval=1.0)
    mask = (jax.random.uniform(km, (N, 1, imsize, imsize)) > 0.5).astype(jnp.float32)

    params = make_params(kp, z_dim)
    taps = gaussian_taps(5, 5.0)

    out = generator_forward(features, x_img, mask, params, taps)
    out = jax.block_until_ready(out)

    ref = reference_forward(features, x_img, mask, params, taps)
    ref = jax.block_until_ready(ref)

    assert out.shape == (N, 3, imsize, imsize)
    err = float(jnp.max(jnp.abs(out - ref)))
    assert jnp.allclose(out, ref, atol=1e-4, rtol=1e-4), f"max abs diff = {err}"

    print("KERNEL_OK")
</pallas_src>

<mosaic_0001>
module attributes {stable_mosaic.version = 11 : i64} {
  func.func @kernel(%arg0: i32, %arg1: memref<2x3x1xf32, #tpu.memory_space<vmem>>, %arg2: memref<2x3x256xf32, #tpu.memory_space<vmem>>, %arg3: memref<2x1x256xf32, #tpu.memory_space<vmem>>, %arg4: memref<4x1x256xf32, #tpu.memory_space<vmem>>, %arg5: memref<4x1x256xf32, #tpu.memory_space<vmem>>, %arg6: memref<2x3x256xf32, #tpu.memory_space<vmem>>) attributes {dimension_semantics = [#tpu.dimension_semantics<parallel>], iteration_bounds = array<i64: 1>, scalar_prefetch = 0 : i64, scratch_operands = 0 : i64, tpu.core_type = #tpu.core_type<tc>, window_params = [{transform_indices = @transform_0, window_bounds = array<i64: 2, 3, 1>}, {transform_indices = @transform_1, window_bounds = array<i64: 2, 3, 256>}, {transform_indices = @transform_2, window_bounds = array<i64: 2, 1, 256>}, {pipeline_mode = #tpu.pipeline_mode<synchronous>, transform_indices = @transform_3, window_bounds = array<i64: 4, 1, 256>}, {pipeline_mode = #tpu.pipeline_mode<synchronous>, transform_indices = @transform_4, window_bounds = array<i64: 4, 1, 256>}, {transform_indices = @transform_5, window_bounds = array<i64: 2, 3, 256>}]} {
    %c0 = arith.constant 0 : index
    %c0_0 = arith.constant 0 : index
    %c0_1 = arith.constant 0 : index
    %0 = vector.load %arg4[%c0, %c0_0, %c0_1] : memref<4x1x256xf32, #tpu.memory_space<vmem>>, vector<1x1x256xf32>
    %1 = vector.shape_cast %0 : vector<1x1x256xf32> to vector<1x256xf32>
    %c1 = arith.constant 1 : index
    %c0_2 = arith.constant 0 : index
    %c0_3 = arith.constant 0 : index
    %2 = vector.load %arg4[%c1, %c0_2, %c0_3] : memref<4x1x256xf32, #tpu.memory_space<vmem>>, vector<1x1x256xf32>
    %3 = vector.shape_cast %2 : vector<1x1x256xf32> to vector<1x256xf32>
    %c2 = arith.constant 2 : index
    %c0_4 = arith.constant 0 : index
    %c0_5 = arith.constant 0 : index
    %4 = vector.load %arg4[%c2, %c0_4, %c0_5] : memref<4x1x256xf32, #tpu.memory_space<vmem>>, vector<1x1x256xf32>
    %5 = vector.shape_cast %4 : vector<1x1x256xf32> to vector<1x256xf32>
    %c3 = arith.constant 3 : index
    %c0_6 = arith.constant 0 : index
    %c0_7 = arith.constant 0 : index
    %6 = vector.load %arg4[%c3, %c0_6, %c0_7] : memref<4x1x256xf32, #tpu.memory_space<vmem>>, vector<1x1x256xf32>
    %7 = vector.shape_cast %6 : vector<1x1x256xf32> to vector<1x256xf32>
    %c0_8 = arith.constant 0 : index
    %c0_9 = arith.constant 0 : index
    %c0_10 = arith.constant 0 : index
    %8 = vector.load %arg5[%c0_8, %c0_9, %c0_10] : memref<4x1x256xf32, #tpu.memory_space<vmem>>, vector<1x1x256xf32>
    %9 = vector.shape_cast %8 : vector<1x1x256xf32> to vector<1x256xf32>
    %c1_11 = arith.constant 1 : index
    %c0_12 = arith.constant 0 : index
    %c0_13 = arith.constant 0 : index
    %10 = vector.load %arg5[%c1_11, %c0_12, %c0_13] : memref<4x1x256xf32, #tpu.memory_space<vmem>>, vector<1x1x256xf32>
    %11 = vector.shape_cast %10 : vector<1x1x256xf32> to vector<1x256xf32>
    %c2_14 = arith.constant 2 : index
    %c0_15 = arith.constant 0 : index
    %c0_16 = arith.constant 0 : index
    %12 = vector.load %arg5[%c2_14, %c0_15, %c0_16] : memref<4x1x256xf32, #tpu.memory_space<vmem>>, vector<1x1x256xf32>
    %13 = vector.shape_cast %12 : vector<1x1x256xf32> to vector<1x256xf32>
    %c3_17 = arith.constant 3 : index
    %c0_18 = arith.constant 0 : index
    %c0_19 = arith.constant 0 : index
    %14 = vector.load %arg5[%c3_17, %c0_18, %c0_19] : memref<4x1x256xf32, #tpu.memory_space<vmem>>, vector<1x1x256xf32>
    %15 = vector.shape_cast %14 : vector<1x1x256xf32> to vector<1x256xf32>
    %c0_20 = arith.constant 0 : index
    %c0_21 = arith.constant 0 : index
    %c0_22 = arith.constant 0 : index
    %16 = vector.load %arg2[%c0_20, %c0_21, %c0_22] : memref<2x3x256xf32, #tpu.memory_space<vmem>>, vector<1x3x256xf32>
    %17 = vector.shape_cast %16 : vector<1x3x256xf32> to vector<3x256xf32>
    %c0_23 = arith.constant 0 : index
    %c0_24 = arith.constant 0 : index
    %c0_25 = arith.constant 0 : index
    %18 = vector.load %arg3[%c0_23, %c0_24, %c0_25] : memref<2x1x256xf32, #tpu.memory_space<vmem>>, vector<1x1x256xf32>
    %19 = vector.shape_cast %18 : vector<1x1x256xf32> to vector<1x256xf32>
    %c0_26 = arith.constant 0 : index
    %c0_27 = arith.constant 0 : index
    %c0_28 = arith.constant 0 : index
    %20 = vector.load %arg1[%c0_26, %c0_27, %c0_28] : memref<2x3x1xf32, #tpu.memory_space<vmem>>, vector<1x3x1xf32>
    %21 = vector.shape_cast %20 : vector<1x3x1xf32> to vector<3x1xf32>
    %22 = vector.broadcast %21 : vector<3x1xf32> to vector<3x256xf32>
    %23 = arith.subf %22, %17 : vector<3x256xf32>
    %24 = vector.broadcast %19 : vector<1x256xf32> to vector<3x256xf32>
    %25 = arith.mulf %24, %23 : vector<3x256xf32>
    %26 = arith.addf %17, %25 : vector<3x256xf32>
    %cst = arith.constant 0.208045974 : f32
    %27 = vector.broadcast %cst : f32 to vector<3x256xf32>
    %28 = arith.mulf %27, %26 : vector<3x256xf32>
    %cst_29 = arith.constant 0.000000e+00 : f32
    %29 = vector.broadcast %cst_29 : f32 to vector<3x256xf32>
    %c2_i32 = arith.constant 2 : i32
    %30 = tpu.dynamic_rotate %26 by %c2_i32 dim 1 : vector<3x256xf32>, i32 -> vector<3x256xf32>
    %31 = vector.broadcast %1 : vector<1x256xf32> to vector<3x256xf32>
    %32 = arith.mulf %30, %31 : vector<3x256xf32>
    %33 = arith.addf %28, %32 : vector<3x256xf32>
    %c1_i32 = arith.constant 1 : i32
    %34 = tpu.dynamic_rotate %26 by %c1_i32 dim 1 : vector<3x256xf32>, i32 -> vector<3x256xf32>
    %35 = vector.broadcast %3 : vector<1x256xf32> to vector<3x256xf32>
    %36 = arith.mulf %34, %35 : vector<3x256xf32>
    %37 = arith.addf %29, %36 : vector<3x256xf32>
    %c255_i32 = arith.constant 255 : i32
    %38 = tpu.dynamic_rotate %26 by %c255_i32 dim 1 : vector<3x256xf32>, i32 -> vector<3x256xf32>
    %39 = vector.broadcast %5 : vector<1x256xf32> to vector<3x256xf32>
    %40 = arith.mulf %38, %39 : vector<3x256xf32>
    %41 = arith.addf %33, %40 : vector<3x256xf32>
    %c254_i32 = arith.constant 254 : i32
    %42 = tpu.dynamic_rotate %26 by %c254_i32 dim 1 : vector<3x256xf32>, i32 -> vector<3x256xf32>
    %43 = vector.broadcast %7 : vector<1x256xf32> to vector<3x256xf32>
    %44 = arith.mulf %42, %43 : vector<3x256xf32>
    %45 = arith.addf %37, %44 : vector<3x256xf32>
    %46 = arith.addf %41, %45 : vector<3x256xf32>
    %cst_30 = arith.constant 0.208045974 : f32
    %47 = vector.broadcast %cst_30 : f32 to vector<3x256xf32>
    %48 = arith.mulf %47, %46 : vector<3x256xf32>
    %cst_31 = arith.constant 0.000000e+00 : f32
    %49 = vector.broadcast %cst_31 : f32 to vector<3x256xf32>
    %c32_i32 = arith.constant 32 : i32
    %50 = tpu.dynamic_rotate %46 by %c32_i32 dim 1 : vector<3x256xf32>, i32 -> vector<3x256xf32>
    %51 = vector.broadcast %9 : vector<1x256xf32> to vector<3x256xf32>
    %52 = arith.mulf %50, %51 : vector<3x256xf32>
    %53 = arith.addf %48, %52 : vector<3x256xf32>
    %c16_i32 = arith.constant 16 : i32
    %54 = tpu.dynamic_rotate %46 by %c16_i32 dim 1 : vector<3x256xf32>, i32 -> vector<3x256xf32>
    %55 = vector.broadcast %11 : vector<1x256xf32> to vector<3x256xf32>
    %56 = arith.mulf %54, %55 : vector<3x256xf32>
    %57 = arith.addf %49, %56 : vector<3x256xf32>
    %c240_i32 = arith.constant 240 : i32
    %58 = tpu.dynamic_rotate %46 by %c240_i32 dim 1 : vector<3x256xf32>, i32 -> vector<3x256xf32>
    %59 = vector.broadcast %13 : vector<1x256xf32> to vector<3x256xf32>
    %60 = arith.mulf %58, %59 : vector<3x256xf32>
    %61 = arith.addf %53, %60 : vector<3x256xf32>
    %c224_i32 = arith.constant 224 : i32
    %62 = tpu.dynamic_rotate %46 by %c224_i32 dim 1 : vector<3x256xf32>, i32 -> vector<3x256xf32>
    %63 = vector.broadcast %15 : vector<1x256xf32> to vector<3x256xf32>
    %64 = arith.mulf %62, %63 : vector<3x256xf32>
    %65 = arith.addf %57, %64 : vector<3x256xf32>
    %66 = arith.addf %61, %65 : vector<3x256xf32>
    %c0_32 = arith.constant 0 : index
    %c0_33 = arith.constant 0 : index
    %c0_34 = arith.constant 0 : index
    %67 = vector.load %arg6[%c0_32, %c0_33, %c0_34] : memref<2x3x256xf32, #tpu.memory_space<vmem>>, vector<1x3x256xf32>
    %68 = vector.shape_cast %67 : vector<1x3x256xf32> to vector<3x256xf32>
    %69 = vector.shape_cast %66 : vector<3x256xf32> to vector<1x3x256xf32>
    tpu.vector_store %arg6[%c0_32, %c0_33, %c0_34], %69 {strides = array<i32>} : memref<2x3x256xf32, #tpu.memory_space<vmem>>, vector<1x3x256xf32>,
    %c1_35 = arith.constant 1 : index
    %c0_36 = arith.constant 0 : index
    %c0_37 = arith.constant 0 : index
    %70 = vector.load %arg2[%c1_35, %c0_36, %c0_37] : memref<2x3x256xf32, #tpu.memory_space<vmem>>, vector<1x3x256xf32>
    %71 = vector.shape_cast %70 : vector<1x3x256xf32> to vector<3x256xf32>
    %c1_38 = arith.constant 1 : index
    %c0_39 = arith.constant 0 : index
    %c0_40 = arith.constant 0 : index
    %72 = vector.load %arg3[%c1_38, %c0_39, %c0_40] : memref<2x1x256xf32, #tpu.memory_space<vmem>>, vector<1x1x256xf32>
    %73 = vector.shape_cast %72 : vector<1x1x256xf32> to vector<1x256xf32>
    %c1_41 = arith.constant 1 : index
    %c0_42 = arith.constant 0 : index
    %c0_43 = arith.constant 0 : index
    %74 = vector.load %arg1[%c1_41, %c0_42, %c0_43] : memref<2x3x1xf32, #tpu.memory_space<vmem>>, vector<1x3x1xf32>
    %75 = vector.shape_cast %74 : vector<1x3x1xf32> to vector<3x1xf32>
    %76 = vector.broadcast %75 : vector<3x1xf32> to vector<3x256xf32>
    %77 = arith.subf %76, %71 : vector<3x256xf32>
    %78 = vector.broadcast %73 : vector<1x256xf32> to vector<3x256xf32>
    %79 = arith.mulf %78, %77 : vector<3x256xf32>
    %80 = arith.addf %71, %79 : vector<3x256xf32>
    %cst_44 = arith.constant 0.208045974 : f32
    %81 = vector.broadcast %cst_44 : f32 to vector<3x256xf32>
    %82 = arith.mulf %81, %80 : vector<3x256xf32>
    %cst_45 = arith.constant 0.000000e+00 : f32
    %83 = vector.broadcast %cst_45 : f32 to vector<3x256xf32>
    %c2_i32_46 = arith.constant 2 : i32
    %84 = tpu.dynamic_rotate %80 by %c2_i32_46 dim 1 : vector<3x256xf32>, i32 -> vector<3x256xf32>
    %85 = vector.broadcast %1 : vector<1x256xf32> to vector<3x256xf32>
    %86 = arith.mulf %84, %85 : vector<3x256xf32>
    %87 = arith.addf %82, %86 : vector<3x256xf32>
    %c1_i32_47 = arith.constant 1 : i32
    %88 = tpu.dynamic_rotate %80 by %c1_i32_47 dim 1 : vector<3x256xf32>, i32 -> vector<3x256xf32>
    %89 = vector.broadcast %3 : vector<1x256xf32> to vector<3x256xf32>
    %90 = arith.mulf %88, %89 : vector<3x256xf32>
    %91 = arith.addf %83, %90 : vector<3x256xf32>
    %c255_i32_48 = arith.constant 255 : i32
    %92 = tpu.dynamic_rotate %80 by %c255_i32_48 dim 1 : vector<3x256xf32>, i32 -> vector<3x256xf32>
    %93 = vector.broadcast %5 : vector<1x256xf32> to vector<3x256xf32>
    %94 = arith.mulf %92, %93 : vector<3x256xf32>
    %95 = arith.addf %87, %94 : vector<3x256xf32>
    %c254_i32_49 = arith.constant 254 : i32
    %96 = tpu.dynamic_rotate %80 by %c254_i32_49 dim 1 : vector<3x256xf32>, i32 -> vector<3x256xf32>
    %97 = vector.broadcast %7 : vector<1x256xf32> to vector<3x256xf32>
    %98 = arith.mulf %96, %97 : vector<3x256xf32>
    %99 = arith.addf %91, %98 : vector<3x256xf32>
    %100 = arith.addf %95, %99 : vector<3x256xf32>
    %cst_50 = arith.constant 0.208045974 : f32
    %101 = vector.broadcast %cst_50 : f32 to vector<3x256xf32>
    %102 = arith.mulf %101, %100 : vector<3x256xf32>
    %cst_51 = arith.constant 0.000000e+00 : f32
    %103 = vector.broadcast %cst_51 : f32 to vector<3x256xf32>
    %c32_i32_52 = arith.constant 32 : i32
    %104 = tpu.dynamic_rotate %100 by %c32_i32_52 dim 1 : vector<3x256xf32>, i32 -> vector<3x256xf32>
    %105 = vector.broadcast %9 : vector<1x256xf32> to vector<3x256xf32>
    %106 = arith.mulf %104, %105 : vector<3x256xf32>
    %107 = arith.addf %102, %106 : vector<3x256xf32>
    %c16_i32_53 = arith.constant 16 : i32
    %108 = tpu.dynamic_rotate %100 by %c16_i32_53 dim 1 : vector<3x256xf32>, i32 -> vector<3x256xf32>
    %109 = vector.broadcast %11 : vector<1x256xf32> to vector<3x256xf32>
    %110 = arith.mulf %108, %109 : vector<3x256xf32>
    %111 = arith.addf %103, %110 : vector<3x256xf32>
    %c240_i32_54 = arith.constant 240 : i32
    %112 = tpu.dynamic_rotate %100 by %c240_i32_54 dim 1 : vector<3x256xf32>, i32 -> vector<3x256xf32>
    %113 = vector.broadcast %13 : vector<1x256xf32> to vector<3x256xf32>
    %114 = arith.mulf %112, %113 : vector<3x256xf32>
    %115 = arith.addf %107, %114 : vector<3x256xf32>
    %c224_i32_55 = arith.constant 224 : i32
    %116 = tpu.dynamic_rotate %100 by %c224_i32_55 dim 1 : vector<3x256xf32>, i32 -> vector<3x256xf32>
    %117 = vector.broadcast %15 : vector<1x256xf32> to vector<3x256xf32>
    %118 = arith.mulf %116, %117 : vector<3x256xf32>
    %119 = arith.addf %111, %118 : vector<3x256xf32>
    %120 = arith.addf %115, %119 : vector<3x256xf32>
    %c1_56 = arith.constant 1 : index
    %c0_57 = arith.constant 0 : index
    %c0_58 = arith.constant 0 : index
    %121 = vector.load %arg6[%c1_56, %c0_57, %c0_58] : memref<2x3x256xf32, #tpu.memory_space<vmem>>, vector<1x3x256xf32>
    %122 = vector.shape_cast %121 : vector<1x3x256xf32> to vector<3x256xf32>
    %123 = vector.shape_cast %120 : vector<3x256xf32> to vector<1x3x256xf32>
    tpu.vector_store %arg6[%c1_56, %c0_57, %c0_58], %123 {strides = array<i32>} : memref<2x3x256xf32, #tpu.memory_space<vmem>>, vector<1x3x256xf32>,
    return
  }
  func.func @transform_0(%arg0: i32) -> (i32, i32, i32) {
    %c0_i32 = arith.constant 0 : i32
    %c0_i32_0 = arith.constant 0 : i32
    %c0_i32_1 = arith.constant 0 : i32
    return %arg0, %c0_i32, %c0_i32_0 : i32, i32, i32
  }
  func.func @transform_1(%arg0: i32) -> (i32, i32, i32) {
    %c0_i32 = arith.constant 0 : i32
    %c0_i32_0 = arith.constant 0 : i32
    %c0_i32_1 = arith.constant 0 : i32
    return %arg0, %c0_i32, %c0_i32_0 : i32, i32, i32
  }
  func.func @transform_2(%arg0: i32) -> (i32, i32, i32) {
    %c0_i32 = arith.constant 0 : i32
    %c0_i32_0 = arith.constant 0 : i32
    %c0_i32_1 = arith.constant 0 : i32
    return %arg0, %c0_i32, %c0_i32_0 : i32, i32, i32
  }
  func.func @transform_3(%arg0: i32) -> (i32, i32, i32) {
    %c0_i32 = arith.constant 0 : i32
    %c0_i32_0 = arith.constant 0 : i32
    %c0_i32_1 = arith.constant 0 : i32
    %c0_i32_2 = arith.constant 0 : i32
    return %c0_i32, %c0_i32_0, %c0_i32_1 : i32, i32, i32
  }
  func.func @transform_4(%arg0: i32) -> (i32, i32, i32) {
    %c0_i32 = arith.constant 0 : i32
    %c0_i32_0 = arith.constant 0 : i32
    %c0_i32_1 = arith.constant 0 : i32
    %c0_i32_2 = arith.constant 0 : i32
    return %c0_i32, %c0_i32_0, %c0_i32_1 : i32, i32, i32
  }
  func.func @transform_5(%arg0: i32) -> (i32, i32, i32) {
    %c0_i32 = arith.constant 0 : i32
    %c0_i32_0 = arith.constant 0 : i32
    %c0_i32_1 = arith.constant 0 : i32
    return %arg0, %c0_i32, %c0_i32_0 : i32, i32, i32
  }
}

</mosaic_0001>

<bundles_post_ra>
// kernel: tpu_custom_call.1
= control target key start
LH: loop header
LB: loop body
LE: loop exit
PB: predicated region body
PF: predicated region fallthrough
CT: control target
= control target key end

     0   :  { %v477_v0 = vmov 0   ;;  %vm60_vm0 = vcmask 1043456   ;;  %s478_s24 = smov 2   ;;  %s479_s25 = smov 1   ;;  %v75_v25 = vlaneseq  ;;  %s789_s0 = inlined_call_operand.vmem [shape: f32[2,3,1], index: 0, kind: input, shape index: {}]   ;;  %s790_s1 = inlined_call_operand.vmem [shape: f32[2,3,256], index: 1, kind: input, shape index: {}]   ;;  %s791_s2 = inlined_call_operand.vmem [shape: f32[2,1,256], index: 2, kind: input, shape index: {}]   ;;  %s792_s3 = inlined_call_operand.vmem [shape: f32[4,1,256], index: 3, kind: input, shape index: {}]   ;;  %s793_s4 = inlined_call_operand.vmem [shape: f32[4,1,256], index: 4, kind: input, shape index: {}]   ;;  %s794_s5 = inlined_call_operand.vmem [shape: f32[2,3,256], index: 5, kind: output, shape index: {}]  }
   0x1   :  { %476 = vset.pattern.permute.xlu0 %v477_v0  ;;  %v36_v1 = vld [vmem:[%s789_s0] sm:$0x7]  ;;  %s480_s26 = smov 127   ;;  %v465_v22 = vld [vmem:[%s789_s0 + $0x4] sm:$0x7]  ;;  %s481_s29 = smov 126  }
   0x2   :  { %v34_v2 = vld [vmem:[%s790_s1] sm:$0x77]  ;;  %39 = vperm.xlu0 %476, %v36_v1   ;;  %v543_v28 = vand.u32 127, %v75_v25  ;;  %s484_s15 = smov 16   ;;  %s485_s16 = smov 96  }
   0x3   :  { %43 = vst [vmem:[#allocation1] ss:$2 sm:$0xff] %v34_v2  ;;  %v35_v3 = vld [vmem:[%s791_s2] sm:$0x3]  ;;  %v555_v32 = vld [vmem:[%s792_s3 + $0x4] sm:$0x3] }
   0x4   :  { %v52_v6 = vperm.slane %v35_v3, 1  ;;  %v51_v8 = vperm.slane %v35_v3, 0  ;;  %v548_v30 = vld [vmem:[%s792_s3] sm:$0x3]  ;;  %vm77_vm1 = vcmp.lt.s32.totalorder %v543_v28, 2  ;;  %vm123_vm2 = vcmp.lt.s32.totalorder %v543_v28, 127 }
   0x5   :  { %v82_v31 = vperm.slane %v548_v30, 1  ;;  %v128_v37 = vperm.slane %v555_v32, 1  ;;  %v568_v40 = vld [vmem:[%s792_s3 + $0x2] sm:$0x3]  ;;  %v81_v41 = vperm.slane %v548_v30, 0  ;;  %vm102_vm3 = vcmp.lt.s32.totalorder %v543_v28, 1 }
   0x6   :  { %v574_v42 = vld [vmem:[%s792_s3 + $0x6] sm:$0x3]  ;;  %v107_v46 = vperm.slane %v568_v40, 1  ;;  %v127_v47 = vperm.slane %v555_v32, 0  ;;  %vm148_vm4 = vcmp.lt.s32.totalorder %v543_v28, 126  ;;  %v106_v54 = vperm.slane %v568_v40, 0 }
   0x7   :  { %v152_v48 = vperm.slane %v574_v42, 0  ;;  %v153_v49 = vperm.slane %v574_v42, 1  ;;  %v683_v40 = vld [vmem:[%s793_s4] sm:$0x3]  ;;  %vm177_vm5 = vcmp.lt.s32.totalorder %v543_v28, 32  ;;  %vm248_vm6 = vcmp.lt.s32.totalorder %v543_v28, 96 }
   0x8   :  { %v689_v42 = vld [vmem:[%s793_s4 + $0x6] sm:$0x3]  ;;  %vm202_vm7 = vcmp.lt.s32.totalorder %v543_v28, 16  ;;  %vm223_vm8 = vcmp.lt.s32.totalorder %v543_v28, 112 }
   0xa   :  { %v44_v4 = vld.sshfl [vmem:[#allocation1] sm:$0xff pattern:$0x75316420]  ;;  %v45_v5 = vld.sshfl [vmem:[#allocation1 + $0x8] sm:$0xff pattern:$0x75316420] }
  0x74   :  { %v40_v7 = vpop.permute.xlu0 %39 }
  0x75   :  { %v48_v9 = vsub.f32 %v40_v7, %v44_v4  ;;  %v49_v10 = vsub.f32 %v40_v7, %v45_v5 }
  0x77   :  { %v56_v11 = vmul.f32 %v52_v6, %v49_v10  ;;  %v55_v12 = vmul.f32 %v51_v8, %v48_v9 }
  0x79   :  { %v59_v13 = vrot.slane %v56_v11, 4 }
  0x7b   :  { %v61_v14 = vsel %vm60_vm0, %v55_v12, %v59_v13 }
  0x7c   :  { %v526_v15 = vadd.f32 %v61_v14, %v34_v2 }
  0x7e   :  { %66 = vst [vmem:[#allocation1] ss:$2 sm:$0xff] %v526_v15  ;;  %v64_v1 = vmul.f32 0.20804597, %v526_v15 }
  0x85   :  { %v67_v16 = vld.sshfl [vmem:[#allocation1] sm:$0xff pattern:$0x75316420]  ;;  %v68_v17 = vld.sshfl [vmem:[#allocation1 + $0x8] sm:$0xff pattern:$0x75316420] }
  0x86   :  { %93 = vst [vmem:[#allocation1] ss:$2 sm:$0xff] %v526_v15  ;;  %73 = vrot.lane.b32.xlu1 %v68_v17, %s478_s24  ;;  %71 = vrot.lane.b32.xlu0 %v67_v16, %s478_s24  ;;  %v463_v17 = vld [vmem:[%s790_s1 + $0x8] sm:$0x77]  ;;  %s482_s1 = smov 32  }
  0x8d   :  { %v94_v18 = vld.sshfl [vmem:[#allocation1] sm:$0xff pattern:$0x75316420]  ;;  %v95_v19 = vld.sshfl [vmem:[#allocation1 + $0x8] sm:$0xff pattern:$0x75316420] }
  0x8e   :  { %114 = vst [vmem:[#allocation1] ss:$2 sm:$0xff] %v526_v15  ;;  %100 = vrot.lane.b32.xlu2 %v95_v19, %s479_s25  ;;  %98 = vrot.lane.b32.xlu1 %v94_v18, %s479_s25 }
  0x95   :  { %v116_v20 = vld.sshfl [vmem:[#allocation1 + $0x8] sm:$0xff pattern:$0x75316420]  ;;  %v115_v21 = vld.sshfl [vmem:[#allocation1] sm:$0xff pattern:$0x75316420] }
  0x96   :  { %121 = vrot.lane.b32.xlu0 %v116_v20, %s480_s26  ;;  %119 = vrot.lane.b32.xlu2 %v115_v21, %s480_s26  ;;  %139 = vst [vmem:[#allocation1] ss:$2 sm:$0xff] %v526_v15  ;;  %v464_v20 = vld [vmem:[%s791_s2 + $0x2] sm:$0x3]  ;;  %s483_s2 = smov 112  }
  0x97   :  { %v288_v21 = vperm.slane %v464_v20, 1  ;;  %v287_v25 = vperm.slane %v464_v20, 0 }
  0x9d   :  { %v141_v23 = vld.sshfl [vmem:[#allocation1 + $0x8] sm:$0xff pattern:$0x75316420]  ;;  %v140_v24 = vld.sshfl [vmem:[#allocation1] sm:$0xff pattern:$0x75316420] }
  0x9e   :  { %275 = vperm.xlu0 %476, %v465_v22   ;;  %146 = vrot.lane.b32.xlu2 %v141_v23, %s481_s29 }
  0x9f   :  { %144 = vrot.lane.b32.xlu1 %v140_v24, %s481_s29 }
  0xe8   :  { %v101_v26 = vpop.permute.xlu2 %100 }
  0xf0   :  { %v120_v33 = vpop.permute.xlu2 %119 }
  0xf8   :  { %v74_v27 = vpop.permute.xlu1 %73  ;;  %v72_v29 = vpop.permute.xlu0 %71 }
  0xf9   :  { %v78_v34 = vsel %vm77_vm1, %v72_v29, %v74_v27  ;;  %v79_v43 = vsel %vm77_vm1, %v74_v27, %v72_v29  ;;  %v147_v53 = vpop.permute.xlu2 %146 }
  0xfa   :  { %v86_v38 = vmul.f32 %v82_v31, %v78_v34  ;;  %v85_v50 = vmul.f32 %v81_v41, %v79_v43 }
  0xfc   :  { %v89_v45 = vrot.slane %v86_v38, 4 }
  0xfe   :  { %v90_v57 = vsel %vm60_vm0, %v85_v50, %v89_v45 }
  0xff   :  { %v92_v5 = vadd.f32 %v90_v57, %v64_v1 }
 0x100   :  { %v99_v36 = vpop.permute.xlu1 %98 }
 0x101   :  { %v103_v51 = vsel %vm102_vm3, %v99_v36, %v101_v26  ;;  %v104_v58 = vsel %vm102_vm3, %v101_v26, %v99_v36 }
 0x102   :  { %v111_v61 = vmul.f32 %v107_v46, %v103_v51  ;;  %v110_v2 = vmul.f32 %v106_v54, %v104_v58 }
 0x108   :  { %v122_v35 = vpop.permute.xlu0 %121 }
 0x109   :  { %v125_v39 = vsel %vm123_vm2, %v122_v35, %v120_v33  ;;  %v124_v52 = vsel %vm123_vm2, %v120_v33, %v122_v35 }
 0x10a   :  { %v132_v44 = vmul.f32 %v128_v37, %v125_v39  ;;  %v131_v62 = vmul.f32 %v127_v47, %v124_v52 }
 0x10c   :  { %v135_v55 = vrot.slane %v132_v44, 4 }
 0x10e   :  { %v136_v3 = vsel %vm60_vm0, %v131_v62, %v135_v55 }
 0x10f   :  { %v138_v8 = vadd.f32 %v136_v3, %v92_v5 }
 0x110   :  { %v276_v22 = vpop.permute.xlu0 %275 }
 0x111   :  { %v145_v56 = vpop.permute.xlu1 %144 }
 0x112   :  { %v149_v59 = vsel %vm148_vm4, %v145_v56, %v147_v53  ;;  %v150_v60 = vsel %vm148_vm4, %v147_v53, %v145_v56 }
 0x113   :  { %v156_v63 = vmul.f32 %v152_v48, %v149_v59  ;;  %v157_v0 = vmul.f32 %v153_v49, %v150_v60 }
 0x115   :  { %v159_v4 = vadd.f32 %v157_v0, %v111_v61  ;;  %v158_v6 = vadd.f32 %v156_v63, %v110_v2 }
 0x117   :  { %v162_v7 = vrot.slane %v159_v4, 4 }
 0x119   :  { %v163_v9 = vsel %vm60_vm0, %v158_v6, %v162_v7 }
 0x11a   :  { %v613_v10 = vadd.f32 %v163_v9, %v138_v8 }
 0x11c   :  { %168 = vst [vmem:[#allocation1] ss:$2 sm:$0xff] %v613_v10 }
 0x123   :  { %v169_v11 = vld.sshfl [vmem:[#allocation1] sm:$0xff pattern:$0x75316420]  ;;  %v170_v12 = vld.sshfl [vmem:[#allocation1 + $0x8] sm:$0xff pattern:$0x75316420] }
 0x124   :  { %193 = vst [vmem:[#allocation1] ss:$2 sm:$0xff] %v613_v10 }
 0x12b   :  { %v194_v13 = vld.sshfl [vmem:[#allocation1] sm:$0xff pattern:$0x75316420]  ;;  %v195_v14 = vld.sshfl [vmem:[#allocation1 + $0x8] sm:$0xff pattern:$0x75316420] }
 0x12c   :  { %214 = vst [vmem:[#allocation1] ss:$2 sm:$0xff] %v613_v10 }
 0x133   :  { %v215_v15 = vld.sshfl [vmem:[#allocation1] sm:$0xff pattern:$0x75316420]  ;;  %v216_v16 = vld.sshfl [vmem:[#allocation1 + $0x8] sm:$0xff pattern:$0x75316420] }
 0x134   :  { %239 = vst [vmem:[#allocation1] ss:$2 sm:$0xff] %v613_v10 }
 0x13b   :  { %v240_v18 = vld.sshfl [vmem:[#allocation1] sm:$0xff pattern:$0x75316420]  ;;  %v241_v19 = vld.sshfl [vmem:[#allocation1 + $0x8] sm:$0xff pattern:$0x75316420] }
 0x13c   :  { %279 = vst [vmem:[#allocation1] ss:$2 sm:$0xff] %v463_v17 }
 0x143   :  { %v280_v23 = vld.sshfl [vmem:[#allocation1] sm:$0xff pattern:$0x75316420]  ;;  %v281_v24 = vld.sshfl [vmem:[#allocation1 + $0x8] sm:$0xff pattern:$0x75316420] }
 0x144   :  { %v284_v26 = vsub.f32 %v276_v22, %v280_v23  ;;  %v285_v27 = vsub.f32 %v276_v22, %v281_v24 }
 0x146   :  { %v292_v29 = vmul.f32 %v288_v21, %v285_v27  ;;  %v291_v33 = vmul.f32 %v287_v25, %v284_v26  ;;  %v253_v26 = vperm.slane %v689_v42, 1 }
 0x148   :  { %v295_v34 = vrot.slane %v292_v29, 4 }
 0x14a   :  { %v296_v35 = vsel %vm60_vm0, %v291_v33, %v295_v34 }
 0x14b   :  { %v298_v36 = vadd.f32 %v463_v17, %v296_v35 }
 0x14d   :  { %301 = vst [vmem:[#allocation1] ss:$2 sm:$0xff] %v298_v36 }
 0x154   :  { %v303_v38 = vld.sshfl [vmem:[#allocation1 + $0x8] sm:$0xff pattern:$0x75316420]  ;;  %v302_v39 = vld.sshfl [vmem:[#allocation1] sm:$0xff pattern:$0x75316420] }
 0x155   :  { %308 = vrot.lane.b32.xlu2 %v303_v38, %s478_s24  ;;  %306 = vrot.lane.b32.xlu1 %v302_v39, %s478_s24  ;;  %320 = vst [vmem:[#allocation1] ss:$2 sm:$0xff] %v298_v36  ;;  %v715_v39 = vld [vmem:[%s793_s4 + $0x4] sm:$0x3] }
 0x15c   :  { %v322_v43 = vld.sshfl [vmem:[#allocation1 + $0x8] sm:$0xff pattern:$0x75316420]  ;;  %v321_v44 = vld.sshfl [vmem:[#allocation1] sm:$0xff pattern:$0x75316420] }
 0x15d   :  { %327 = vrot.lane.b32.xlu1 %v322_v43, %s479_s25  ;;  %325 = vrot.lane.b32.xlu0 %v321_v44, %s479_s25  ;;  %335 = vst [vmem:[#allocation1] ss:$2 sm:$0xff] %v298_v36  ;;  %v181_v43 = vperm.slane %v683_v40, 0 }
 0x164   :  { %v337_v45 = vld.sshfl [vmem:[#allocation1 + $0x8] sm:$0xff pattern:$0x75316420]  ;;  %v336_v50 = vld.sshfl [vmem:[#allocation1] sm:$0xff pattern:$0x75316420] }
 0x165   :  { %342 = vrot.lane.b32.xlu0 %v337_v45, %s480_s26  ;;  %340 = vrot.lane.b32.xlu2 %v336_v50, %s480_s26  ;;  %354 = vst [vmem:[#allocation1] ss:$2 sm:$0xff] %v298_v36 }
 0x16c   :  { %v356_v51 = vld.sshfl [vmem:[#allocation1 + $0x8] sm:$0xff pattern:$0x75316420]  ;;  %v355_v52 = vld.sshfl [vmem:[#allocation1] sm:$0xff pattern:$0x75316420] }
 0x16d   :  { %173 = vrot.lane.b32.xlu0 %v169_v11, %s482_s1  ;;  %361 = vrot.lane.b32.xlu2 %v356_v51, %s481_s29  ;;  %v252_v51 = vperm.slane %v689_v42, 0 }
 0x16e   :  { %359 = vrot.lane.b32.xlu1 %v355_v52, %s481_s29 }
 0x175   :  { %219 = vrot.lane.b32.xlu0 %v215_v15, %s483_s2  ;;  %200 = vrot.lane.b32.xlu2 %v195_v14, %s484_s15  ;;  %v299_v14 = vmul.f32 0.20804597, %v298_v36 }
 0x176   :  { %175 = vrot.lane.b32.xlu1 %v170_v12, %s482_s1 }
 0x17d   :  { %246 = vrot.lane.b32.xlu0 %v241_v19, %s485_s16  ;;  %244 = vrot.lane.b32.xlu2 %v240_v18, %s485_s16 }
 0x17e   :  { %198 = vrot.lane.b32.xlu1 %v194_v13, %s484_s15 }
 0x186   :  { %221 = vrot.lane.b32.xlu1 %v216_v16, %s483_s2 }
 0x1af   :  { %v309_v53 = vpop.permute.xlu2 %308 }
 0x1bf   :  { %v341_v57 = vpop.permute.xlu2 %340 }
 0x1c7   :  { %v307_v55 = vpop.permute.xlu1 %306  ;;  %v362_v0 = vpop.permute.xlu2 %361 }
 0x1c8   :  { %v310_v58 = vsel %vm77_vm1, %v307_v55, %v309_v53  ;;  %v311_v63 = vsel %vm77_vm1, %v309_v53, %v307_v55  ;;  %v228_v55 = vperm.slane %v715_v39, 1 }
 0x1c9   :  { %v313_v61 = vmul.f32 %v310_v58, %v82_v31  ;;  %v312_v3 = vmul.f32 %v311_v63, %v81_v41 }
 0x1cb   :  { %v316_v2 = vrot.slane %v313_v61, 4 }
 0x1cd   :  { %v317_v8 = vsel %vm60_vm0, %v312_v3, %v316_v2 }
 0x1ce   :  { %v319_v18 = vadd.f32 %v317_v8, %v299_v14 }
 0x1cf   :  { %v326_v56 = vpop.permute.xlu0 %325  ;;  %v328_v60 = vpop.permute.xlu1 %327 }
 0x1d0   :  { %v329_v4 = vsel %vm102_vm3, %v326_v56, %v328_v60  ;;  %v330_v9 = vsel %vm102_vm3, %v328_v60, %v326_v56  ;;  %v201_v19 = vpop.permute.xlu2 %200  ;;  %v227_v60 = vperm.slane %v715_v39, 0 }
 0x1d1   :  { %v332_v41 = vmul.f32 %v329_v4, %v107_v46  ;;  %v331_v15 = vmul.f32 %v330_v9, %v106_v54  ;;  %v182_v54 = vperm.slane %v683_v40, 1 }
 0x1d7   :  { %v343_v59 = vpop.permute.xlu0 %342 }
 0x1d8   :  { %v345_v62 = vsel %vm123_vm2, %v343_v59, %v341_v57  ;;  %v344_v31 = vsel %vm123_vm2, %v341_v57, %v343_v59  ;;  %v245_v25 = vpop.permute.xlu2 %244 }
 0x1d9   :  { %v347_v1 = vmul.f32 %v345_v62, %v128_v37  ;;  %v346_v11 = vmul.f32 %v344_v31, %v127_v47 }
 0x1db   :  { %v350_v6 = vrot.slane %v347_v1, 4 }
 0x1dd   :  { %v351_v16 = vsel %vm60_vm0, %v346_v11, %v350_v6 }
 0x1de   :  { %v353_v21 = vadd.f32 %v351_v16, %v319_v18 }
 0x1df   :  { %v174_v5 = vpop.permute.xlu0 %173 }
 0x1e0   :  { %v360_v7 = vpop.permute.xlu1 %359 }
 0x1e1   :  { %v363_v37 = vsel %vm148_vm4, %v360_v7, %v362_v0  ;;  %v364_v30 = vsel %vm148_vm4, %v362_v0, %v360_v7 }
 0x1e2   :  { %v365_v12 = vmul.f32 %v363_v37, %v152_v48  ;;  %v366_v13 = vmul.f32 %v364_v30, %v153_v49  ;;  %v694_v49 = vld [vmem:[%s793_s4 + $0x2] sm:$0x3] }
 0x1e3   :  { %v207_v27 = vperm.slane %v694_v49, 1  ;;  %v206_v53 = vperm.slane %v694_v49, 0 }
 0x1e4   :  { %v368_v17 = vadd.f32 %v366_v13, %v332_v41  ;;  %v367_v20 = vadd.f32 %v365_v12, %v331_v15 }
 0x1e6   :  { %v371_v46 = vrot.slane %v368_v17, 4 }
 0x1e7   :  { %v220_v32 = vpop.permute.xlu0 %219 }
 0x1e8   :  { %v372_v47 = vsel %vm60_vm0, %v367_v20, %v371_v46  ;;  %v176_v22 = vpop.permute.xlu1 %175 }
 0x1e9   :  { %v677_v48 = vadd.f32 %v372_v47, %v353_v21  ;;  %v178_v23 = vsel %vm177_vm5, %v174_v5, %v176_v22  ;;  %v179_v50 = vsel %vm177_vm5, %v176_v22, %v174_v5  ;;  %v166_v5 = vmul.f32 0.20804597, %v613_v10 }
 0x1ea   :  { %v186_v35 = vmul.f32 %v182_v54, %v178_v23  ;;  %v185_v58 = vmul.f32 %v181_v43, %v179_v50 }
 0x1eb   :  { %377 = vst [vmem:[#allocation1] ss:$2 sm:$0xff] %v677_v48 }
 0x1ec   :  { %v189_v52 = vrot.slane %v186_v35, 4 }
 0x1ee   :  { %v190_v0 = vsel %vm60_vm0, %v185_v58, %v189_v52  ;;  %v375_v52 = vmul.f32 0.20804597, %v677_v48 }
 0x1ef   :  { %v247_v24 = vpop.permute.xlu0 %246  ;;  %v192_v9 = vadd.f32 %v190_v0, %v166_v5 }
 0x1f0   :  { %v199_v29 = vpop.permute.xlu1 %198  ;;  %v250_v33 = vsel %vm248_vm6, %v247_v24, %v245_v25  ;;  %v249_v56 = vsel %vm248_vm6, %v245_v25, %v247_v24 }
 0x1f1   :  { %v203_v34 = vsel %vm202_vm7, %v199_v29, %v201_v19  ;;  %v257_v44 = vmul.f32 %v253_v26, %v250_v33  ;;  %v204_v57 = vsel %vm202_vm7, %v201_v19, %v199_v29  ;;  %v256_v1 = vmul.f32 %v252_v51, %v249_v56 }
 0x1f2   :  { %v379_v36 = vld.sshfl [vmem:[#allocation1 + $0x8] sm:$0xff pattern:$0x75316420]  ;;  %v378_v38 = vld.sshfl [vmem:[#allocation1] sm:$0xff pattern:$0x75316420]  ;;  %v211_v45 = vmul.f32 %v207_v27, %v203_v34  ;;  %v210_v2 = vmul.f32 %v206_v53, %v204_v57 }
 0x1f3   :  { %384 = vrot.lane.b32.xlu0 %v379_v36, %s482_s1  ;;  %382 = vrot.lane.b32.xlu2 %v378_v38, %s482_s1  ;;  %396 = vst [vmem:[#allocation1] ss:$2 sm:$0xff] %v677_v48 }
 0x1f4   :  { %v259_v59 = vadd.f32 %v257_v44, %v211_v45  ;;  %v258_v37 = vadd.f32 %v256_v1, %v210_v2 }
 0x1f6   :  { %v262_v6 = vrot.slane %v259_v59, 4 }
 0x1f8   :  { %v222_v61 = vpop.permute.xlu1 %221  ;;  %v263_v11 = vsel %vm60_vm0, %v258_v37, %v262_v6 }
 0x1f9   :  { %v224_v62 = vsel %vm223_vm8, %v220_v32, %v222_v61  ;;  %v225_v63 = vsel %vm223_vm8, %v222_v61, %v220_v32 }
 0x1fa   :  { %v232_v3 = vmul.f32 %v228_v55, %v225_v63  ;;  %v398_v4 = vld.sshfl [vmem:[#allocation1 + $0x8] sm:$0xff pattern:$0x75316420]  ;;  %v397_v31 = vld.sshfl [vmem:[#allocation1] sm:$0xff pattern:$0x75316420]  ;;  %v231_v7 = vmul.f32 %v227_v60, %v224_v62 }
 0x1fb   :  { %403 = vrot.lane.b32.xlu2 %v398_v4, %s484_s15  ;;  %401 = vrot.lane.b32.xlu1 %v397_v31, %s484_s15  ;;  %411 = vst [vmem:[#allocation1] ss:$2 sm:$0xff] %v677_v48 }
 0x1fc   :  { %v235_v8 = vrot.slane %v232_v3, 4 }
 0x1fe   :  { %v236_v30 = vsel %vm60_vm0, %v231_v7, %v235_v8 }
 0x1ff   :  { %v238_v41 = vadd.f32 %v236_v30, %v192_v9 }
 0x201   :  { %v265_v12 = vadd.f32 %v263_v11, %v238_v41 }
 0x202   :  { %v413_v13 = vld.sshfl [vmem:[#allocation1 + $0x8] sm:$0xff pattern:$0x75316420]  ;;  %v412_v14 = vld.sshfl [vmem:[#allocation1] sm:$0xff pattern:$0x75316420] }
 0x203   :  { %266 = vst [vmem:[%s794_s5] sm:$0x77] %v265_v12  ;;  %418 = vrot.lane.b32.xlu1 %v413_v13, %s483_s2  ;;  %416 = vrot.lane.b32.xlu0 %v412_v14, %s483_s2 }
 0x204   :  { %430 = vst [vmem:[#allocation1] ss:$2 sm:$0xff] %v677_v48 }
 0x20b   :  { %v432_v10 = vld.sshfl [vmem:[#allocation1 + $0x8] sm:$0xff pattern:$0x75316420]  ;;  %v431_v15 = vld.sshfl [vmem:[#allocation1] sm:$0xff pattern:$0x75316420] }
 0x20c   :  { %437 = vrot.lane.b32.xlu0 %v432_v10, %s485_s16  ;;  %435 = vrot.lane.b32.xlu2 %v431_v15, %s485_s16 }
 0x24d   :  { %v383_v16 = vpop.permute.xlu2 %382 }
 0x255   :  { %v404_v21 = vpop.permute.xlu2 %403 }
 0x265   :  { %v385_v17 = vpop.permute.xlu0 %384 }
 0x266   :  { %v386_v19 = vsel %vm177_vm5, %v383_v16, %v385_v17  ;;  %v387_v22 = vsel %vm177_vm5, %v385_v17, %v383_v16  ;;  %v436_v34 = vpop.permute.xlu2 %435 }
 0x267   :  { %v389_v32 = vmul.f32 %v386_v19, %v182_v54  ;;  %v388_v25 = vmul.f32 %v387_v22, %v181_v43 }
 0x269   :  { %v392_v24 = vrot.slane %v389_v32, 4 }
 0x26b   :  { %v393_v40 = vsel %vm60_vm0, %v388_v25, %v392_v24 }
 0x26c   :  { %v395_v28 = vadd.f32 %v393_v40, %v375_v52 }
 0x26d   :  { %v402_v18 = vpop.permute.xlu1 %401 }
 0x26e   :  { %v405_v29 = vsel %vm202_vm7, %v402_v18, %v404_v21  ;;  %v406_v54 = vsel %vm202_vm7, %v404_v21, %v402_v18 }
 0x26f   :  { %v408_v43 = vmul.f32 %v405_v29, %v207_v27 }
 0x275   :  { %v419_v20 = vpop.permute.xlu1 %418  ;;  %v417_v46 = vpop.permute.xlu0 %416 }
 0x276   :  { %v421_v47 = vsel %vm223_vm8, %v419_v20, %v417_v46  ;;  %v420_v33 = vsel %vm223_vm8, %v417_v46, %v419_v20 }
 0x277   :  { %v423_v23 = vmul.f32 %v421_v47, %v228_v55  ;;  %v422_v44 = vmul.f32 %v420_v33, %v227_v60  ;;  %v407_v55 = vmul.f32 %v406_v54, %v206_v53 }
 0x279   :  { %v426_v35 = vrot.slane %v423_v23, 4 }
 0x27b   :  { %v427_v56 = vsel %vm60_vm0, %v422_v44, %v426_v35 }
 0x27c   :  { %v429_v61 = vadd.f32 %v427_v56, %v395_v28 }
 0x27e   :  { %v438_v36 = vpop.permute.xlu0 %437 }
 0x27f   :  { %v439_v38 = vsel %vm248_vm6, %v436_v34, %v438_v36  ;;  %v440_v39 = vsel %vm248_vm6, %v438_v36, %v436_v34 }
 0x280   :  { %v441_v45 = vmul.f32 %v439_v38, %v252_v51  ;;  %v442_v50 = vmul.f32 %v440_v39, %v253_v26 }
 0x282   :  { %v444_v57 = vadd.f32 %v442_v50, %v408_v43  ;;  %v443_v58 = vadd.f32 %v441_v45, %v407_v55 }
 0x284   :  { %v447_v59 = vrot.slane %v444_v57, 4 }
 0x286   :  { %v448_v27 = vsel %vm60_vm0, %v443_v58, %v447_v59 }
 0x287   :  { %v450_v60 = vadd.f32 %v448_v27, %v429_v61 }
 0x289   :  { %466 = vst [vmem:[%s794_s5 + $0x8] sm:$0x77] %v450_v60 }

</bundles_post_ra>
